<compile_context>
chip_gen: v6e
topology: v6e:2x2x1
jax: 0.10.0
libtpu: 0.0.40
codegen_flags: <defaults>
</compile_context>

<pallas_src>
import jax
import jax.numpy as jnp
from jax import lax
from jax.experimental import pallas as pl
from jax.experimental.pallas import tpu as pltpu

_LANES = 128          # lane width of a vreg
_TS_TARGET = 1024     # sublane rows per pixel tile -> up to 128K pixels / tile


def _cdiv(a, b):
    return -(-a // b)


def segmentation_loss(predictions, targets, w_l):
    """JAX/Pallas equivalent of ExampleSegmentationLoss.forward.

    predictions: [N, C, H, W] float logits (NCHW, as in PyTorch)
    targets:     list of C-1 arrays, each [N, H, W] (binary masks)
    w_l:         [C] per-class weights
    """
    N, C, H, W = predictions.shape
    assert len(targets) == C - 1, "expected classes-1 target masks"
    P = H * W                                  # pixels per image

    # ---- lane-dense layout: pixels -> (rows, 128) lanes ---------------------
    S_total = _cdiv(P, _LANES)                 # sublane rows needed
    TS = min(_TS_TARGET, _cdiv(S_total, 8) * 8)  # rows per tile (multiple of 8)
    T = _cdiv(S_total, TS)                     # pixel tiles per image
    S_pad = T * TS
    P_pad = S_pad * _LANES
    needs_mask = (P_pad != P)

    # Free reshapes only (no transpose of the logits in HBM).
    logits = predictions.reshape(N, C, P)
    masks = jnp.stack(list(targets), axis=0).astype(jnp.float32).reshape(C - 1, N, P)
    if needs_mask:
        pad = P_pad - P
        logits = jnp.pad(logits, ((0, 0), (0, 0), (0, pad)))
        masks = jnp.pad(masks, ((0, 0), (0, 0), (0, pad)))
    logits = logits.reshape(N, C, S_pad, _LANES)
    masks = masks.reshape(C - 1, N, S_pad, _LANES)
    w = jnp.asarray(w_l, jnp.float32).reshape(C)

    def kernel(w_ref, logits_ref, masks_ref, num_ref, den_ref):
        f32 = jnp.float32
        # ---- fused target construction ------------------------------------
        # c* = classes - argmax(stack([ones] + targets)[::-1]) - 1
        #    = largest class index whose mask value attains the max
        #      (class 0's mask is the implicit all-ones tensor).
        best_val = jnp.ones((TS, _LANES), f32)           # class 0 value
        best_cls = jnp.zeros((TS, _LANES), jnp.int32)    # class 0 index
        for c in range(1, C):
            v = masks_ref[c - 1, 0].astype(f32)
            take = v >= best_val     # ties -> larger c == first max of reversed stack
            best_val = jnp.where(take, v, best_val)
            best_cls = jnp.where(take, c, best_cls)

        # ---- stable log-softmax over classes, unrolled over C --------------
        m = logits_ref[0, 0].astype(f32)
        for c in range(1, C):
            m = jnp.maximum(m, logits_ref[0, c].astype(f32))

        ssum = jnp.zeros((TS, _LANES), f32)
        picked = jnp.zeros((TS, _LANES), f32)
        wpix = jnp.zeros((TS, _LANES), f32)
        for c in range(C):
            z = logits_ref[0, c].astype(f32) - m
            ssum = ssum + jnp.exp(z)
            sel = best_cls == c
            picked = jnp.where(sel, z, picked)
            wpix = jnp.where(sel, w_ref[c], wpix)

        if needs_mask:
            # Zero the weight of padded (out-of-range) pixels in the last tile.
            row = lax.broadcasted_iota(jnp.int32, (TS, _LANES), 0)
            lane = lax.broadcasted_iota(jnp.int32, (TS, _LANES), 1)
            pix = (pl.program_id(1) * TS + row) * _LANES + lane
            wpix = jnp.where(pix < P, wpix, 0.0)

        nll_w = wpix * (jnp.log(ssum) - picked)          # w[tgt] * (-log p[tgt])
        num_ref[...] = jnp.full(num_ref.shape, jnp.sum(nll_w), f32)
        den_ref[...] = jnp.full(den_ref.shape, jnp.sum(wpix), f32)

    num_part, den_part = pl.pallas_call(
        kernel,
        out_shape=(
            jax.ShapeDtypeStruct((N, T, 8, _LANES), jnp.float32),
            jax.ShapeDtypeStruct((N, T, 8, _LANES), jnp.float32),
        ),
        grid_spec=pl.GridSpec(
            grid=(N, T),
            in_specs=[
                pl.BlockSpec(memory_space=pltpu.MemorySpace.SMEM),           # w_l
                pl.BlockSpec((1, C, TS, _LANES), lambda n, t: (n, 0, t, 0)),  # logits
                pl.BlockSpec((C - 1, 1, TS, _LANES), lambda n, t: (0, n, t, 0)),  # masks
            ],
            out_specs=[
                pl.BlockSpec((1, 1, 8, _LANES), lambda n, t: (n, t, 0, 0)),
                pl.BlockSpec((1, 1, 8, _LANES), lambda n, t: (n, t, 0, 0)),
            ],
        ),
        compiler_params=pltpu.CompilerParams(
            dimension_semantics=("parallel", "parallel")),
    )(w, logits, masks)

    num = jnp.sum(num_part[:, :, 0, 0])
    den = jnp.sum(den_part[:, :, 0, 0])
    return num / den


def _reference_loss(predictions, targets, w_l):
    """Pure-JAX reference mirroring nn.CrossEntropyLoss(weight, 'mean')."""
    C = predictions.shape[1]
    all_t = [jnp.ones_like(targets[0])] + list(targets)
    stacked = jnp.stack(all_t[::-1], axis=1)
    y = (C - jnp.argmax(stacked, axis=1) - 1).reshape(-1)
    logits = jnp.moveaxis(predictions, 1, -1).reshape(-1, C)
    lse = jax.scipy.special.logsumexp(logits, axis=-1)
    picked = jnp.take_along_axis(logits, y[:, None], axis=-1)[:, 0]
    w = jnp.asarray(w_l, jnp.float32)[y]
    return jnp.sum(w * (lse - picked)) / jnp.sum(w)


if __name__ == "__main__":
    key = jax.random.PRNGKey(0)
    N, C, H, W = 2, 4, 16, 16

    kp, k1, k2, k3 = jax.random.split(key, 4)
    predictions = jax.random.normal(kp, (N, C, H, W), jnp.float32)
    # classes - 1 = 3 binary target masks, each [N, H, W]
    targets = [
        jax.random.bernoulli(k, 0.3, (N, H, W)).astype(jnp.float32)
        for k in (k1, k2, k3)
    ]
    # Deterministic per-class weights (module default would be all ones).
    w_l = jnp.array([1.0, 0.5, 2.0, 1.5], jnp.float32)

    loss = segmentation_loss(predictions, targets, w_l)
    loss = jax.block_until_ready(loss)

    ref = _reference_loss(predictions, targets, w_l)
    assert jnp.allclose(loss, ref, rtol=1e-5, atol=1e-5), (float(loss), float(ref))

    print("KERNEL_OK")
</pallas_src>

<mosaic_0001>
module attributes {stable_mosaic.version = 11 : i64} {
  func.func @kernel(%arg0: i32, %arg1: i32, %arg2: memref<4xf32, #tpu.memory_space<smem>>, %arg3: memref<1x4x8x128xf32, #tpu.memory_space<vmem>>, %arg4: memref<3x1x8x128xf32, #tpu.memory_space<vmem>>, %arg5: memref<1x1x8x128xf32, #tpu.memory_space<vmem>>, %arg6: memref<1x1x8x128xf32, #tpu.memory_space<vmem>>) attributes {dimension_semantics = [#tpu.dimension_semantics<parallel>, #tpu.dimension_semantics<parallel>], iteration_bounds = array<i64: 2, 1>, scalar_prefetch = 0 : i64, scratch_operands = 0 : i64, tpu.core_type = #tpu.core_type<tc>, window_params = [{transform_indices = @transform_0, window_bounds = array<i64: 4>}, {transform_indices = @transform_1, window_bounds = array<i64: 1, 4, 8, 128>}, {transform_indices = @transform_2, window_bounds = array<i64: 3, 1, 8, 128>}, {transform_indices = @transform_3, window_bounds = array<i64: 1, 1, 8, 128>}, {transform_indices = @transform_4, window_bounds = array<i64: 1, 1, 8, 128>}]} {
    %cst = arith.constant 1.000000e+00 : f32
    %0 = vector.broadcast %cst : f32 to vector<8x128xf32>
    %c0_i32 = arith.constant 0 : i32
    %1 = vector.broadcast %c0_i32 : i32 to vector<8x128xi32>
    %c0 = arith.constant 0 : index
    %c0_0 = arith.constant 0 : index
    %c0_1 = arith.constant 0 : index
    %c0_2 = arith.constant 0 : index
    %2 = vector.load %arg4[%c0, %c0_0, %c0_1, %c0_2] : memref<3x1x8x128xf32, #tpu.memory_space<vmem>>, vector<1x1x8x128xf32>
    %3 = vector.shape_cast %2 : vector<1x1x8x128xf32> to vector<8x128xf32>
    %4 = arith.cmpf oge, %3, %0 : vector<8x128xf32>
    %5 = arith.select %4, %3, %0 : vector<8x128xi1>, vector<8x128xf32>
    %c1_i32 = arith.constant 1 : i32
    %6 = vector.broadcast %c1_i32 : i32 to vector<8x128xi32>
    %7 = arith.select %4, %6, %1 : vector<8x128xi1>, vector<8x128xi32>
    %c1 = arith.constant 1 : index
    %c0_3 = arith.constant 0 : index
    %c0_4 = arith.constant 0 : index
    %c0_5 = arith.constant 0 : index
    %8 = vector.load %arg4[%c1, %c0_3, %c0_4, %c0_5] : memref<3x1x8x128xf32, #tpu.memory_space<vmem>>, vector<1x1x8x128xf32>
    %9 = vector.shape_cast %8 : vector<1x1x8x128xf32> to vector<8x128xf32>
    %10 = arith.cmpf oge, %9, %5 : vector<8x128xf32>
    %11 = arith.select %10, %9, %5 : vector<8x128xi1>, vector<8x128xf32>
    %c2_i32 = arith.constant 2 : i32
    %12 = vector.broadcast %c2_i32 : i32 to vector<8x128xi32>
    %13 = arith.select %10, %12, %7 : vector<8x128xi1>, vector<8x128xi32>
    %c2 = arith.constant 2 : index
    %c0_6 = arith.constant 0 : index
    %c0_7 = arith.constant 0 : index
    %c0_8 = arith.constant 0 : index
    %14 = vector.load %arg4[%c2, %c0_6, %c0_7, %c0_8] : memref<3x1x8x128xf32, #tpu.memory_space<vmem>>, vector<1x1x8x128xf32>
    %15 = vector.shape_cast %14 : vector<1x1x8x128xf32> to vector<8x128xf32>
    %16 = arith.cmpf oge, %15, %11 : vector<8x128xf32>
    %c3_i32 = arith.constant 3 : i32
    %17 = vector.broadcast %c3_i32 : i32 to vector<8x128xi32>
    %18 = arith.select %16, %17, %13 : vector<8x128xi1>, vector<8x128xi32>
    %c0_9 = arith.constant 0 : index
    %c0_10 = arith.constant 0 : index
    %c0_11 = arith.constant 0 : index
    %c0_12 = arith.constant 0 : index
    %19 = vector.load %arg3[%c0_9, %c0_10, %c0_11, %c0_12] : memref<1x4x8x128xf32, #tpu.memory_space<vmem>>, vector<1x1x8x128xf32>
    %20 = vector.shape_cast %19 : vector<1x1x8x128xf32> to vector<8x128xf32>
    %c0_13 = arith.constant 0 : index
    %c1_14 = arith.constant 1 : index
    %c0_15 = arith.constant 0 : index
    %c0_16 = arith.constant 0 : index
    %21 = vector.load %arg3[%c0_13, %c1_14, %c0_15, %c0_16] : memref<1x4x8x128xf32, #tpu.memory_space<vmem>>, vector<1x1x8x128xf32>
    %22 = vector.shape_cast %21 : vector<1x1x8x128xf32> to vector<8x128xf32>
    %23 = arith.maximumf %20, %22 : vector<8x128xf32>
    %c0_17 = arith.constant 0 : index
    %c2_18 = arith.constant 2 : index
    %c0_19 = arith.constant 0 : index
    %c0_20 = arith.constant 0 : index
    %24 = vector.load %arg3[%c0_17, %c2_18, %c0_19, %c0_20] : memref<1x4x8x128xf32, #tpu.memory_space<vmem>>, vector<1x1x8x128xf32>
    %25 = vector.shape_cast %24 : vector<1x1x8x128xf32> to vector<8x128xf32>
    %26 = arith.maximumf %23, %25 : vector<8x128xf32>
    %c0_21 = arith.constant 0 : index
    %c3 = arith.constant 3 : index
    %c0_22 = arith.constant 0 : index
    %c0_23 = arith.constant 0 : index
    %27 = vector.load %arg3[%c0_21, %c3, %c0_22, %c0_23] : memref<1x4x8x128xf32, #tpu.memory_space<vmem>>, vector<1x1x8x128xf32>
    %28 = vector.shape_cast %27 : vector<1x1x8x128xf32> to vector<8x128xf32>
    %29 = arith.maximumf %26, %28 : vector<8x128xf32>
    %cst_24 = arith.constant 0.000000e+00 : f32
    %30 = vector.broadcast %cst_24 : f32 to vector<8x128xf32>
    %cst_25 = arith.constant 0.000000e+00 : f32
    %31 = vector.broadcast %cst_25 : f32 to vector<8x128xf32>
    %cst_26 = arith.constant 0.000000e+00 : f32
    %32 = vector.broadcast %cst_26 : f32 to vector<8x128xf32>
    %c0_27 = arith.constant 0 : index
    %c0_28 = arith.constant 0 : index
    %c0_29 = arith.constant 0 : index
    %c0_30 = arith.constant 0 : index
    %33 = vector.load %arg3[%c0_27, %c0_28, %c0_29, %c0_30] : memref<1x4x8x128xf32, #tpu.memory_space<vmem>>, vector<1x1x8x128xf32>
    %34 = vector.shape_cast %33 : vector<1x1x8x128xf32> to vector<8x128xf32>
    %35 = arith.subf %34, %29 : vector<8x128xf32>
    %36 = math.exp %35 : vector<8x128xf32>
    %37 = arith.addf %30, %36 : vector<8x128xf32>
    %c0_i32_31 = arith.constant 0 : i32
    %38 = vector.broadcast %c0_i32_31 : i32 to vector<8x128xi32>
    %39 = arith.cmpi eq, %18, %38 : vector<8x128xi32>
    %40 = arith.select %39, %35, %31 : vector<8x128xi1>, vector<8x128xf32>
    %c0_32 = arith.constant 0 : index
    %41 = memref.load %arg2[%c0_32] : memref<4xf32, #tpu.memory_space<smem>>
    %42 = vector.broadcast %41 : f32 to vector<8x128xf32>
    %43 = arith.select %39, %42, %32 : vector<8x128xi1>, vector<8x128xf32>
    %c0_33 = arith.constant 0 : index
    %c1_34 = arith.constant 1 : index
    %c0_35 = arith.constant 0 : index
    %c0_36 = arith.constant 0 : index
    %44 = vector.load %arg3[%c0_33, %c1_34, %c0_35, %c0_36] : memref<1x4x8x128xf32, #tpu.memory_space<vmem>>, vector<1x1x8x128xf32>
    %45 = vector.shape_cast %44 : vector<1x1x8x128xf32> to vector<8x128xf32>
    %46 = arith.subf %45, %29 : vector<8x128xf32>
    %47 = math.exp %46 : vector<8x128xf32>
    %48 = arith.addf %37, %47 : vector<8x128xf32>
    %c1_i32_37 = arith.constant 1 : i32
    %49 = vector.broadcast %c1_i32_37 : i32 to vector<8x128xi32>
    %50 = arith.cmpi eq, %18, %49 : vector<8x128xi32>
    %51 = arith.select %50, %46, %40 : vector<8x128xi1>, vector<8x128xf32>
    %c1_38 = arith.constant 1 : index
    %52 = memref.load %arg2[%c1_38] : memref<4xf32, #tpu.memory_space<smem>>
    %53 = vector.broadcast %52 : f32 to vector<8x128xf32>
    %54 = arith.select %50, %53, %43 : vector<8x128xi1>, vector<8x128xf32>
    %c0_39 = arith.constant 0 : index
    %c2_40 = arith.constant 2 : index
    %c0_41 = arith.constant 0 : index
    %c0_42 = arith.constant 0 : index
    %55 = vector.load %arg3[%c0_39, %c2_40, %c0_41, %c0_42] : memref<1x4x8x128xf32, #tpu.memory_space<vmem>>, vector<1x1x8x128xf32>
    %56 = vector.shape_cast %55 : vector<1x1x8x128xf32> to vector<8x128xf32>
    %57 = arith.subf %56, %29 : vector<8x128xf32>
    %58 = math.exp %57 : vector<8x128xf32>
    %59 = arith.addf %48, %58 : vector<8x128xf32>
    %c2_i32_43 = arith.constant 2 : i32
    %60 = vector.broadcast %c2_i32_43 : i32 to vector<8x128xi32>
    %61 = arith.cmpi eq, %18, %60 : vector<8x128xi32>
    %62 = arith.select %61, %57, %51 : vector<8x128xi1>, vector<8x128xf32>
    %c2_44 = arith.constant 2 : index
    %63 = memref.load %arg2[%c2_44] : memref<4xf32, #tpu.memory_space<smem>>
    %64 = vector.broadcast %63 : f32 to vector<8x128xf32>
    %65 = arith.select %61, %64, %54 : vector<8x128xi1>, vector<8x128xf32>
    %c0_45 = arith.constant 0 : index
    %c3_46 = arith.constant 3 : index
    %c0_47 = arith.constant 0 : index
    %c0_48 = arith.constant 0 : index
    %66 = vector.load %arg3[%c0_45, %c3_46, %c0_47, %c0_48] : memref<1x4x8x128xf32, #tpu.memory_space<vmem>>, vector<1x1x8x128xf32>
    %67 = vector.shape_cast %66 : vector<1x1x8x128xf32> to vector<8x128xf32>
    %68 = arith.subf %67, %29 : vector<8x128xf32>
    %69 = math.exp %68 : vector<8x128xf32>
    %70 = arith.addf %59, %69 : vector<8x128xf32>
    %c3_i32_49 = arith.constant 3 : i32
    %71 = vector.broadcast %c3_i32_49 : i32 to vector<8x128xi32>
    %72 = arith.cmpi eq, %18, %71 : vector<8x128xi32>
    %73 = arith.select %72, %68, %62 : vector<8x128xi1>, vector<8x128xf32>
    %c3_50 = arith.constant 3 : index
    %74 = memref.load %arg2[%c3_50] : memref<4xf32, #tpu.memory_space<smem>>
    %75 = vector.broadcast %74 : f32 to vector<8x128xf32>
    %76 = arith.select %72, %75, %65 : vector<8x128xi1>, vector<8x128xf32>
    %77 = tpu.iota {dimensions = array<i32: 0>} : vector<8x128xi32>
    %78 = tpu.iota {dimensions = array<i32: 1>} : vector<8x128xi32>
    %c8_i32 = arith.constant 8 : i32
    %79 = arith.muli %arg1, %c8_i32 : i32
    %80 = vector.broadcast %79 : i32 to vector<8x128xi32>
    %81 = arith.addi %80, %77 : vector<8x128xi32>
    %c128_i32 = arith.constant 128 : i32
    %82 = vector.broadcast %c128_i32 : i32 to vector<8x128xi32>
    %83 = arith.muli %81, %82 : vector<8x128xi32>
    %84 = arith.addi %83, %78 : vector<8x128xi32>
    %c256_i32 = arith.constant 256 : i32
    %85 = vector.broadcast %c256_i32 : i32 to vector<8x128xi32>
    %86 = arith.cmpi slt, %84, %85 : vector<8x128xi32>
    %cst_51 = arith.constant 0.000000e+00 : f32
    %87 = vector.broadcast %cst_51 : f32 to vector<8x128xf32>
    %88 = arith.select %86, %76, %87 : vector<8x128xi1>, vector<8x128xf32>
    %89 = math.log %70 : vector<8x128xf32>
    %90 = arith.subf %89, %73 : vector<8x128xf32>
    %91 = arith.mulf %88, %90 : vector<8x128xf32>
    %92 = vector.shape_cast %91 : vector<8x128xf32> to vector<1x8x128xf32>
    %cst_52 = arith.constant dense<0.000000e+00> : vector<1xf32>
    %93 = vector.multi_reduction <add>, %92, %cst_52 [1, 2] : vector<1x8x128xf32> to vector<1xf32>
    %94 = vector.shape_cast %93 : vector<1xf32> to vector<1x1x1xf32>
    %95 = vector.extract %94[0, 0, 0] : f32 from vector<1x1x1xf32>
    %96 = vector.broadcast %95 : f32 to vector<1x1x8x128xf32>
    %c0_53 = arith.constant 0 : index
    %c0_54 = arith.constant 0 : index
    %c0_55 = arith.constant 0 : index
    %c0_56 = arith.constant 0 : index
    %97 = vector.load %arg5[%c0_53, %c0_54, %c0_55, %c0_56] : memref<1x1x8x128xf32, #tpu.memory_space<vmem>>, vector<1x1x8x128xf32>
    tpu.vector_store %arg5[%c0_53, %c0_54, %c0_55, %c0_56], %96 {strides = array<i32>} : memref<1x1x8x128xf32, #tpu.memory_space<vmem>>, vector<1x1x8x128xf32>,
    %98 = vector.shape_cast %88 : vector<8x128xf32> to vector<1x8x128xf32>
    %cst_57 = arith.constant dense<0.000000e+00> : vector<1xf32>
    %99 = vector.multi_reduction <add>, %98, %cst_57 [1, 2] : vector<1x8x128xf32> to vector<1xf32>
    %100 = vector.shape_cast %99 : vector<1xf32> to vector<1x1x1xf32>
    %101 = vector.extract %100[0, 0, 0] : f32 from vector<1x1x1xf32>
    %102 = vector.broadcast %101 : f32 to vector<1x1x8x128xf32>
    %c0_58 = arith.constant 0 : index
    %c0_59 = arith.constant 0 : index
    %c0_60 = arith.constant 0 : index
    %c0_61 = arith.constant 0 : index
    %103 = vector.load %arg6[%c0_58, %c0_59, %c0_60, %c0_61] : memref<1x1x8x128xf32, #tpu.memory_space<vmem>>, vector<1x1x8x128xf32>
    tpu.vector_store %arg6[%c0_58, %c0_59, %c0_60, %c0_61], %102 {strides = array<i32>} : memref<1x1x8x128xf32, #tpu.memory_space<vmem>>, vector<1x1x8x128xf32>,
    return
  }
  func.func @transform_0(%arg0: i32, %arg1: i32) -> i32 {
    %c0_i32 = arith.constant 0 : i32
    %c0_i32_0 = arith.constant 0 : i32
    return %c0_i32 : i32
  }
  func.func @transform_1(%arg0: i32, %arg1: i32) -> (i32, i32, i32, i32) {
    %c0_i32 = arith.constant 0 : i32
    %c0_i32_0 = arith.constant 0 : i32
    %c0_i32_1 = arith.constant 0 : i32
    return %arg0, %c0_i32, %arg1, %c0_i32_0 : i32, i32, i32, i32
  }
  func.func @transform_2(%arg0: i32, %arg1: i32) -> (i32, i32, i32, i32) {
    %c0_i32 = arith.constant 0 : i32
    %c0_i32_0 = arith.constant 0 : i32
    %c0_i32_1 = arith.constant 0 : i32
    return %c0_i32, %arg0, %arg1, %c0_i32_0 : i32, i32, i32, i32
  }
  func.func @transform_3(%arg0: i32, %arg1: i32) -> (i32, i32, i32, i32) {
    %c0_i32 = arith.constant 0 : i32
    %c0_i32_0 = arith.constant 0 : i32
    %c0_i32_1 = arith.constant 0 : i32
    return %arg0, %arg1, %c0_i32, %c0_i32_0 : i32, i32, i32, i32
  }
  func.func @transform_4(%arg0: i32, %arg1: i32) -> (i32, i32, i32, i32) {
    %c0_i32 = arith.constant 0 : i32
    %c0_i32_0 = arith.constant 0 : i32
    %c0_i32_1 = arith.constant 0 : i32
    return %arg0, %arg1, %c0_i32, %c0_i32_0 : i32, i32, i32, i32
  }
}

</mosaic_0001>

<bundles_post_ra>
// kernel: tpu_custom_call.1
= control target key start
LH: loop header
LB: loop body
LE: loop exit
PB: predicated region body
PF: predicated region fallthrough
CT: control target
= control target key end

     0   :  { %s1154_s0 = inlined_call_operand.hbm [shape: f32[4], index: 0, kind: input, shape index: {}]   ;;  %s1155_s1 = inlined_call_operand.hbm [shape: f32[2,4,8,128], index: 1, kind: input, shape index: {}]   ;;  %s1156_s2 = inlined_call_operand.hbm [shape: f32[3,2,8,128], index: 2, kind: input, shape index: {}]   ;;  %s1157_s3 = inlined_call_operand.hbm [shape: f32[2,1,8,128], index: 3, kind: output, shape index: {0}]   ;;  %s1158_s4 = inlined_call_operand.hbm [shape: f32[2,1,8,128], index: 4, kind: output, shape index: {1}]  }
   0x1   :  { %1163 = sst [smem:[#allocation20_spill]] %s1154_s0 }
   0x2   :  { %1164 = sst [smem:[#allocation21_spill]] %s1155_s1 }
   0x3   :  { %10 = vsyncpa [#allocation5], 0 }
   0x4   :  { %11 = vsyncpa [#allocation3], 0 }
   0x5   :  { %13 = vsyncpa [#allocation3 + $0x1], 0 }
   0x6   :  { %14 = vsyncpa [#allocation8], 0 }
   0x7   :  { %16 = vsyncpa [#allocation8 + $0x1], 0 }
   0x8   :  { %17 = vsyncpa [#allocation4], 0 }
   0x9   :  { %19 = vsyncpa [#allocation4 + $0x1], 0 }
   0xa   :  { %20 = vsyncpa [#allocation11], 0 }
   0xb   :  { %22 = vsyncpa [#allocation11 + $0x1], 0  ;;  %s933_s15 = smov 0   ;;  %s935_s16 = smov 0  }
   0xc   :  { %s937_s17 = smov 0   ;;  %s939_s18 = smov 0  }
   0xd   :  { %s941_s19 = smov 0   ;;  %s943_s20 = smov 0  }
   0xe LB: > { %1165 = sst [smem:[#allocation17_spill]] %s897_s20  ;;  %s580_s21 = sadd.s32 4294967295, %s897_s20   ;;  %s897_s20 = sphi %s943_s20, %s1186_s20   ;;  %s893_s19 = sphi %s941_s19, %s1185_s19   ;;  %s889_s18 = sphi %s939_s18, %s1184_s18   ;;  %s885_s17 = sphi %s937_s17, %s1183_s17   ;;  %s881_s16 = sphi %s935_s16, %s1182_s16   ;;  %s877_s15 = sphi %s933_s15, %s1181_s15  }
   0xf   : > { %s581_s22 = sadd.s32 4294967294, %s897_s20   ;;  %s70_s23 = sadd.s32 1, %s885_s17 }
  0x10   : > { %p77_p0 = scmp.ne.s32.totalorder %s885_s17, %s881_s16  ;;  %p78_p1 = scmp.eq.s32.totalorder %s897_s20, 0 }
  0x11   : > { %p83_p2 = scmp.ne.s32.totalorder %s881_s16, %s877_s15  ;;  %p971_p3 = scmp.eq.s32.totalorder %s580_s21, 0 }
  0x12   : > { %p137_p4 = scmp.eq.s32.totalorder %s580_s21, 1  ;;  %p79_p5 = por %p78_p1, %p77_p0 }
  0x13   : > { %p143_p6 = scmp.eq.s32.totalorder %s581_s22, 1  ;;  %p977_p7 = por %p971_p3, %p83_p2 }
  0x14   : > { %p981_p8 = por %p137_p4, %p77_p0  ;;  %p582_p10 = scmp.ge.s32.totalorder %s897_s20, 1 }
  0x15   : > { %p985_p9 = por %p143_p6, %p83_p2  ;;  %p178_p11 = scmp.lt.s32.totalorder %s897_s20, 3 }
  0x16   : > { %p646_p1 = scmp.lt.s32.totalorder %s897_s20, 2  ;;  %s998_s29 = sand.u32 1, %s885_s17  }
  0x17   : > { %s1169_s27 = scalar_select %p985_p9, 1, 0 }
  0x18   : > { %p992_p13 = pnand %p582_p10, %p178_p11  ;;  %p1002_p2 = pnand %p646_p1, %p79_p5 }
  0x19   : > { %1170 = sst [smem:[#allocation18_spill]] %s1169_s27  ;;  %s40_s5 = sadd.s32 1, %s893_s19 }
  0x1a   : > { %p627_p0 = pneg %p992_p13  ;;  %s585_s6 = sshll.u32 %s998_s29, 5 }
  0x1b   : > { %p42_p6 = scmp.ge.s32.totalorder %s40_s5, 2  ;;  %s899_s7 = smov [#allocation2]  }
  0x1c   : > { %p628_p4 = pnand %p627_p0, %p971_p3  ;;  %s1173_s0 = sld [smem:[#allocation20_spill]] }
  0x1d   : > { %s1188_s5 = smov (%p42_p6, %s40_s5), 0  ;;  %s608_s10 = sshll.u32 %s893_s19, 9 }
  0x1e   : > { %1174 = sst [smem:[#allocation19_spill]] %s1188_s5  ;;  %s65_s11 = ssub.s32 %s893_s19, %s1188_s5 }
  0x1f   : > { %s1175_s1 = sld [smem:[#allocation21_spill]]  ;;  %p68_p5 = scmp.eq.s32.totalorder %s65_s11, 0 }
  0x20   : > { %s204_s21 = scalar_lea.vmem [#allocation6], %s585_s6  ;;  %s201_s27 = scalar_lea.sflag [#allocation3], %s998_s29 }
  0x21   : > { %s212_s22 = sshll.u32 %s204_s21, 4  ;;  %p725_p10 = pneg %p1002_p2  ;;  %s213_s22 = int_to_ptr.vmem [resolvable:$true] %s212_s22 }
  0x22   : > { %630 = dma.hbm_to_smem (!%p628_p4), %s1173_s0, 16, %s899_s7, [#allocation5]  }
  0x23   : > { %s1024_s20 = scalar_select %p68_p5, %s885_s17, %s70_s23  }
  0x24   : > { %s736_s7 = scalar_lea.vmem %s213_s22, 512  ;;  %s900_s8 = smov [#allocation6]  }
  0x25   : > { %s211_s14 = scalar_lea.hbm %s1175_s1, %s608_s10  ;;  %p737_p11 = scmp.ne.s32.totalorder %s213_s22, %s736_s7 }
  0x26   : > { %s741_s9 = sshll.u32 %s900_s8, 4  ;;  %s742_s9 = int_to_ptr.vmem [resolvable:$false] %s741_s9 }
  0x27   : > { %p739_p1 = pnand %p737_p11, %p725_p10  ;;  %s743_s10 = scalar_lea.vmem %s742_s9, 1024 }
  0x28   : > { %p744_p4 = scmp.lt.s32.totalorder %s213_s22, %s742_s9  ;;  %p745_p6 = scmp.lt.s32.totalorder %s743_s10, %s736_s7 }
  0x29   : > { %p740_p0 = pneg %p739_p1 }
  0x2a   : > { %p746_p12 = por %p745_p6, %p744_p4 }
  0x2c   : > { %p747_p9 = pnand %p746_p12, %p740_p0 }
  0x2e   : > { %750 = shalt.err (!%p747_p9)
}
  0x2f   : > { %s901_s23 = smov 128   ;;  %s902_s6 = smov 8  }
  0x30   : > { %634 = dma.hbm_to_vmem [thread:$0]  (!%p1002_p2), %s211_s14, 512, %s213_s22, %s201_s27, %s901_s23, %s901_s23, %s902_s6  }
  0x31   : > { %s609_s11 = smul.u32 24, %s998_s29  ;;  %s588_s12 = sshll.u32 %s893_s19, 7 }
  0x32   : > { %s232_s8 = scalar_lea.hbm %s1156_s2, %s588_s12  ;;  %s223_s10 = scalar_lea.sflag [#allocation8], %s998_s29 }
  0x33   : > { %s226_s9 = scalar_lea.vmem [#allocation7], %s609_s11  ;;  %s903_s1 = smov [#allocation7]  }
  0x34   : > { %s233_s7 = sshll.u32 %s226_s9, 4  ;;  %s769_s5 = sshll.u32 %s903_s1, 4  ;;  %s234_s7 = int_to_ptr.vmem [resolvable:$true] %s233_s7  ;;  %s770_s5 = int_to_ptr.vmem [resolvable:$false] %s769_s5 }
  0x35   : > { %s764_s0 = scalar_lea.vmem %s234_s7, 384  ;;  %s771_s27 = scalar_lea.vmem %s770_s5, 768 }
  0x36   : > { %p765_p9 = scmp.ne.s32.totalorder %s234_s7, %s764_s0  ;;  %p772_p11 = scmp.lt.s32.totalorder %s234_s7, %s770_s5 }
  0x37   : > { %p773_p1 = scmp.lt.s32.totalorder %s771_s27, %s764_s0 }
  0x38   : > { %p767_p12 = pnand %p765_p9, %p725_p10 }
  0x39   : > { %p774_p0 = por %p773_p1, %p772_p11 }
  0x3a   : > { %p768_p5 = pneg %p767_p12 }
  0x3c   : > { %p775_p4 = pnand %p774_p0, %p768_p5 }
  0x3e   : > { %778 = shalt.err (!%p775_p4)
}
  0x3f   : > { %s904_s14 = smov 256   ;;  %245 = sbr.rel (%p992_p13) target bundleno = 368 (0x170), region = 32 }
  0x40   : > { %637 = dma.hbm_to_vmem [thread:$0]  (!%p1002_p2), %s232_s8, 384, %s234_s7, %s223_s10, %s904_s14, %s901_s23, %s902_s6  }
  0x44   : > { %856 = dma.done.wait (%p971_p3), [#allocation5], 16  }
  0x45   : > { %858 = vsyncadd (%p971_p3), [#allocation5], 4294967280  ;;  %s1052_s1 = sand.u32 1, %s881_s16  }
  0x46   : > { %s591_s0 = sshll.u32 %s1052_s1, 5  ;;  %s252_s29 = scalar_lea.sflag [#allocation3], %s1052_s1 }
  0x47   : > { %s255_s5 = scalar_lea.vmem [#allocation6], %s591_s0 }
  0x48   : > { %860 = dma.done.wait (%p977_p7), %s252_s29, 512  }
  0x49   : > { %862 = vsyncadd (%p977_p7), %s252_s29, 4294966784  ;;  %s610_s28 = smul.u32 24, %s1052_s1  ;;  %s261_s24 = scalar_lea.sflag [#allocation8], %s1052_s1 }
  0x4b   : > { %s1062_s30 = scalar_lea.vmem [#allocation7], %s610_s28 }
  0x4c   : > { %864 = dma.done.wait (%p977_p7), %s261_s24, 384  }
  0x4d   : > { %866 = vsyncadd (%p977_p7), %s261_s24, 4294966912 }
  0x4e   : > { %269 = sfence }
  0x4f   : > { %v313_v0 = vld [vmem:[%s255_s5] sm:$0xff]  ;;  %v596_v1 = vld [vmem:[%s255_s5 + $0x8] sm:$0xff]  ;;  %v597_v2 = vld [vmem:[%s255_s5 + $0x10] sm:$0xff]  ;;  %v905_v18 = vmov 0   ;;  %s329_s25 = sld [smem:[#allocation2]]  ;;  %v359_v29 = vlaneseq  ;;  %s592_s11 = sshll.u32 %s1052_s1, 3 }
  0x50   : > { %v316_v3 = vmax.f32 %v313_v0, %v596_v1  ;;  %v598_v4 = vld [vmem:[%s255_s5 + $0x18] sm:$0xff]  ;;  %v594_v17 = vld [vmem:[%s1062_s30 + $0x8] sm:$0xff]  ;;  %v595_v21 = vld [vmem:[%s1062_s30 + $0x10] sm:$0xff]  ;;  %s599_s22 = sld [smem:[#allocation2 + $0x1]]  ;;  %s604_s12 = sshll.u32 %s889_s18, 7 }
  0x51   : > { %v300_v15 = vld [vmem:[%s1062_s30] sm:$0xff]  ;;  %s600_s23 = sld [smem:[#allocation2 + $0x2]]  ;;  %v360_v33 = vshrl.u32 %v359_v29, 7  ;;  %v362_v37 = vand.u32 127, %v359_v29  ;;  %s292_s13 = scalar_lea.vmem [#allocation9], %s592_s11 }
  0x52   : > { %v319_v5 = vmax.f32 %v316_v3, %v597_v2  ;;  %vm301_vm0 = vcmp.ge.f32.partialorder %v300_v15, 1.0  ;;  %s601_s6 = sld [smem:[#allocation2 + $0x3]]  ;;  %s416_s21 = sshll.u32 %s292_s13, 4  ;;  %s1083_s21 = int_to_ptr.vmem [resolvable:$true] %s416_s21 }
  0x53   : > { %v302_v16 = vsel %vm301_vm0, %v300_v15, 1.0  ;;  %v303_v19 = vsel %vm301_vm0, 1, %v905_v18  ;;  %v366_v38 = vmul.u32 128, %v360_v33  ;;  %s1073_s8 = scalar_lea.vmem [#allocation10], %s592_s11  ;;  %s1081_s27 = scalar_lea.hbm %s1157_s3, %s604_s12 }
  0x54   : > { %v322_v6 = vmax.f32 %v319_v5, %v598_v4  ;;  %vm306_vm1 = vcmp.ge.f32.partialorder %v594_v17, %v302_v16  ;;  %s430_s9 = sshll.u32 %s1073_s8, 4  ;;  %s397_s0 = scalar_lea.sflag [#allocation4], %s1052_s1  ;;  %s1085_s9 = int_to_ptr.vmem [resolvable:$true] %s430_s9 }
  0x55   : > { %v307_v20 = vsel %vm306_vm1, %v594_v17, %v302_v16  ;;  %v308_v25 = vsel %vm306_vm1, 2, %v303_v19  ;;  %v330_v32 = vstv %s329_s25  ;;  %v367_v42 = vadd.s32 %v366_v38, %v362_v37  ;;  %s779_s29 = scalar_lea.vmem %s1083_s21, 128  ;;  %s906_s5 = smov [#allocation9]  }
  0x56   : > { %v323_v7 = vsub.f32 %v313_v0, %v322_v6  ;;  %v332_v8 = vsub.f32 %v596_v1, %v322_v6  ;;  %v341_v9 = vsub.f32 %v597_v2, %v322_v6  ;;  %v350_v10 = vsub.f32 %v598_v4, %v322_v6  ;;  %p780_p3 = scmp.ne.s32.totalorder %s1083_s21, %s779_s29  ;;  %s783_s28 = sshll.u32 %s906_s5, 4  ;;  %s784_s28 = int_to_ptr.vmem [resolvable:$false] %s783_s28 }
  0x57   : > { %vm311_vm2 = vcmp.ge.f32.partialorder %v595_v21, %v307_v20  ;;  %v339_v35 = vstv %s599_s22  ;;  %v348_v40 = vstv %s600_s23  ;;  %vm368_vm7 = vcmp.lt.s32.totalorder %v367_v42, 256  ;;  %s785_s24 = scalar_lea.vmem %s784_s28, 256  ;;  %p786_p2 = scmp.lt.s32.totalorder %s1083_s21, %s784_s28 }
  0x58   : > { %v324_v11 = vmul.f32 1.442695, %v323_v7  ;;  %v333_v12 = vmul.f32 1.442695, %v332_v8  ;;  %v342_v13 = vmul.f32 1.442695, %v341_v9  ;;  %v357_v44 = vstv %s601_s6  ;;  %p781_p7 = pnand %p780_p3, %p981_p8  ;;  %p787_p10 = scmp.lt.s32.totalorder %s785_s24, %s779_s29 }
  0x59   : > { %v351_v14 = vmul.f32 1.442695, %v350_v10  ;;  %v312_v30 = vsel %vm311_vm2, 3, %v308_v25 }
  0x5a   : > { %702 = vpow2.f32 %v324_v11  ;;  %vm327_vm3 = vcmp.eq.s32.totalorder %v312_v30, 0  ;;  %vm336_vm4 = vcmp.eq.s32.totalorder %v312_v30, 1  ;;  %vm345_vm5 = vcmp.eq.s32.totalorder %v312_v30, 2  ;;  %p782_p13 = pneg %p781_p7  ;;  %p788_p6 = por %p787_p10, %p786_p2 }
  0x5b   : > { %704 = vpow2.f32 %v333_v12  ;;  %v331_v34 = vsel %vm327_vm3, %v330_v32, 0.0  ;;  %v328_v36 = vsel %vm327_vm3, %v323_v7, 0.0  ;;  %vm354_vm6 = vcmp.eq.s32.totalorder %v312_v30, 3 }
  0x5c   : > { %706 = vpow2.f32 %v342_v13  ;;  %v340_v39 = vsel %vm336_vm4, %v339_v35, %v331_v34  ;;  %v337_v41 = vsel %vm336_vm4, %v332_v8, %v328_v36  ;;  %p789_p9 = pnand %p788_p6, %p782_p13 }
  0x5d   : > { %708 = vpow2.f32 %v351_v14  ;;  %v349_v43 = vsel %vm345_vm5, %v348_v40, %v340_v39  ;;  %v346_v45 = vsel %vm345_vm5, %v341_v9, %v337_v41 }
  0x5e   : > { %v358_v46 = vsel %vm354_vm6, %v357_v44, %v349_v43  ;;  %v355_v48 = vsel %vm354_vm6, %v350_v10, %v346_v45 }
  0x5f   : > { %v369_v50 = vsel %vm368_vm7, %v358_v46, 0.0 }
  0x67   : > { %v703_v22 = vpop.eup %702 }
  0x68   : > { %v705_v23 = vpop.eup %704 }
  0x69   : > { %v707_v24 = vpop.eup %706  ;;  %v335_v26 = vadd.f32 %v705_v23, %v703_v22 }
  0x6a   : > { %v709_v27 = vpop.eup %708 }
  0x6b   : > { %v344_v28 = vadd.f32 %v707_v24, %v335_v26 }
  0x6d   : > { %v353_v31 = vadd.f32 %v709_v27, %v344_v28 }
  0x6f   : > { %710 = vlog2.f32 %v353_v31 }
  0x7c   : > { %v711_v47 = vpop.eup %710 }
  0x7d   : > { %v371_v49 = vmul.f32 0.6931472, %v711_v47 }
  0x7f   : > { %v372_v51 = vsub.f32 %v371_v49, %v355_v48 }
  0x81   : > { %v373_v52 = vmul.f32 %v372_v51, %v369_v50 }
  0x83   : > { %374 = vadd.xlane.f32.xlu0 %v373_v52 }
  0x87   : > { %385 = vadd.xlane.f32.xlu0 %v369_v50 }
 0x10c   : > { %v375_v53 = vpop.xlane.xlu0 %374 }
 0x10d   : > { %v376_v54 = vrot.slane %v375_v53, 4 }
 0x10f   : > { %v377_v55 = vadd.f32 %v376_v54, %v375_v53 }
 0x110   : > { %v386_v56 = vpop.xlane.xlu0 %385 }
 0x111   : > { %v378_v57 = vrot.slane %v377_v55, 2  ;;  %v387_v58 = vrot.slane %v386_v56, 4 }
 0x113   : > { %v388_v59 = vadd.f32 %v387_v58, %v386_v56  ;;  %v379_v60 = vadd.f32 %v378_v57, %v377_v55 }
 0x115   : > { %v389_v61 = vrot.slane %v388_v59, 2  ;;  %v380_v62 = vrot.slane %v379_v60, 1 }
 0x117   : > { %v390_v63 = vadd.f32 %v389_v61, %v388_v59  ;;  %v381_v0 = vadd.f32 %v380_v62, %v379_v60 }
 0x119   : > { %611 = vpush %v381_v0  ;;  %v391_v1 = vrot.slane %v390_v63, 1 }
 0x11b   : > { %v392_v2 = vadd.f32 %v391_v1, %v390_v63 }
 0x11d   : > { %613 = vpush %v392_v2 }
 0x14a   : > { %s612_s14 = spop %611 }
 0x14b   : > { %v383_v3 = vstv %s612_s14 }
 0x14c   : > { %384 = vst [vmem:[%s292_s13] sm:$0xff] %v383_v3 }
 0x14d   : > { %792 = shalt.err (!%p789_p9)
}
 0x14e   : > { %s793_s30 = scalar_lea.hbm %s1081_s27, 128  ;;  %s797_s23 = scalar_lea.hbm %s1157_s3, 256 }
 0x14f   : > { %p794_p12 = scmp.ne.s32.totalorder %s1081_s27, %s793_s30  ;;  %p798_p1 = scmp.lt.s32.totalorder %s1081_s27, %s1157_s3 }
 0x150   : > { %p799_p0 = scmp.lt.s32.totalorder %s797_s23, %s793_s30 }
 0x151   : > { %p795_p5 = pnand %p794_p12, %p981_p8 }
 0x152   : > { %p800_p4 = por %p799_p0, %p798_p1 }
 0x153   : > { %p796_p11 = pneg %p795_p5 }
 0x155   : > { %p801_p3 = pnand %p800_p4, %p796_p11 }
 0x157   : > { %804 = shalt.err (!%p801_p3)
}
 0x158   : > { %623 = dma.vmem_to_hbm [thread:$0]  (%p981_p8), %s1083_s21, 128, %s1081_s27, %s397_s0  }
 0x159   : > { %s614_s13 = spop %613  ;;  %s428_s14 = scalar_lea.hbm %s1158_s4, %s604_s12 }
 0x15a   : > { %v394_v4 = vstv %s614_s13  ;;  %s402_s29 = scalar_lea.sflag [#allocation11], %s1052_s1  ;;  %s805_s5 = scalar_lea.vmem %s1085_s9, 128 }
 0x15b   : > { %395 = vst [vmem:[%s1073_s8] sm:$0xff] %v394_v4  ;;  %p806_p7 = scmp.ne.s32.totalorder %s1085_s9, %s805_s5  ;;  %s907_s28 = smov [#allocation10]  }
 0x15c   : > { %s809_s24 = sshll.u32 %s907_s28, 4  ;;  %s810_s24 = int_to_ptr.vmem [resolvable:$false] %s809_s24 }
 0x15d   : > { %p807_p13 = pnand %p806_p7, %p981_p8  ;;  %s811_s30 = scalar_lea.vmem %s810_s24, 256 }
 0x15e   : > { %p812_p10 = scmp.lt.s32.totalorder %s1085_s9, %s810_s24  ;;  %p813_p6 = scmp.lt.s32.totalorder %s811_s30, %s805_s5 }
 0x15f   : > { %p808_p2 = pneg %p807_p13 }
 0x160   : > { %p814_p9 = por %p813_p6, %p812_p10 }
 0x162   : > { %p815_p12 = pnand %p814_p9, %p808_p2 }
 0x164   : > { %818 = shalt.err (!%p815_p12)
}
 0x165   : > { %s819_s18 = scalar_lea.hbm %s428_s14, 128  ;;  %s823_s21 = scalar_lea.hbm %s1158_s4, 256 }
 0x166   : > { %p820_p5 = scmp.ne.s32.totalorder %s428_s14, %s819_s18  ;;  %p824_p0 = scmp.lt.s32.totalorder %s428_s14, %s1158_s4 }
 0x167   : > { %p825_p4 = scmp.lt.s32.totalorder %s823_s21, %s819_s18 }
 0x168   : > { %p821_p11 = pnand %p820_p5, %p981_p8 }
 0x169   : > { %p826_p3 = por %p825_p4, %p824_p0 }
 0x16a   : > { %p822_p1 = pneg %p821_p11 }
 0x16c   : > { %p827_p7 = pnand %p826_p3, %p822_p1 }
 0x16e   : > { %830 = shalt.err (!%p827_p7)
}
 0x16f   : > { %624 = dma.vmem_to_hbm [thread:$0]  (%p981_p8), %s1085_s9, 128, %s428_s14, %s402_s29  }
 0x170 PF: > { %s1176_s0 = sld [smem:[#allocation18_spill]]  ;;  %s442_s22 = sand.u32 1, %s877_s15  }
 0x171   : > { %s1177_s25 = sld [smem:[#allocation17_spill]]  ;;  %s443_s23 = scalar_lea.sflag [#allocation4], %s442_s22 }
 0x176   : > { %p1178_p13 = scmp.ne.s32.totalorder %s1176_s0, 0 }
 0x177   : > { %p1179_p2 = scmp.ge.s32.totalorder %s1177_s25, 2 }
 0x179   : > { %p639_p10 = pnand %p1179_p2, %p1178_p13 }
 0x17b   : > { %p640_p6 = pneg %p639_p10 }
 0x17d   : > { %868 = dma.done.wait (%p640_p6), %s443_s23, 128  }
 0x17e   : > { %870 = vsyncadd (%p640_p6), %s443_s23, 4294967168  ;;  %s452_s6 = scalar_lea.sflag [#allocation11], %s442_s22 }
 0x17f   : > { %872 = dma.done.wait (%p640_p6), %s452_s6, 128  }
 0x180   : > { %874 = vsyncadd (%p640_p6), %s452_s6, 4294967168  ;;  %s28_s11 = sadd.s32 1, %s1177_s25   ;;  %s1180_s26 = sld [smem:[#allocation19_spill]] }
 0x181   : > { %p25_p9 = scmp.ge.s32.totalorder %s28_s11, 4   ;;  %s1181_s15 = smov %s881_s16 }
 0x182   : > { %s1182_s16 = smov %s885_s17  ;;  %s1183_s17 = smov %s1024_s20 }
 0x183   : > { %s1184_s18 = smov %s893_s19  ;;  %s1186_s20 = smov %s28_s11 }
 0x184   :  { %27 = sbr.rel (!%p25_p9) target bundleno = 14 (0xe), region = 117 }
 0x186   : > { %s1185_s19 = smov %s1180_s26 }
 0x189   :  { %457 = vsyncpa [#allocation3], 1 }
 0x18a   :  { %459 = vsyncpa [#allocation3 + $0x1], 1 }
 0x18b   :  { %460 = vsyncpa [#allocation8], 1 }
 0x18c   :  { %462 = vsyncpa [#allocation8 + $0x1], 1 }
 0x18d   :  { %463 = vsyncpa [#allocation4], 1 }
 0x18e   :  { %465 = vsyncpa [#allocation4 + $0x1], 1 }
 0x18f   :  { %466 = vsyncpa [#allocation11], 1 }
 0x190   :  { %468 = vsyncpa [#allocation11 + $0x1], 1 }
 0x191   :  { %469 = vsyncpa [#allocation5], 1 }
 0x192   :  { %471 = vsyncpa [#allocation5 + $0x1], 1 }

</bundles_post_ra>
